<compile_context>
chip_gen: v7x
topology: tpu7x:2x2x1
jax: 0.10.0
libtpu: 0.0.40
codegen_flags: <defaults>
</compile_context>

<pallas_src>
import functools

import jax
import jax.numpy as jnp
from jax import lax
from jax.experimental import pallas as pl
from jax.experimental.pallas import tpu as pltpu


def _label_smoothing_kernel(x_ref, t_ref, out_ref, *,
                            confidence, smoothing, inv_c, total_rows, tile_b):
    i = pl.program_id(0)

    # Cast to f32 exactly like x.float() / target.float() in the reference.
    x = x_ref[...].astype(jnp.float32)
    t = t_ref[...].astype(jnp.float32)

    # Numerically-stable log-sum-exp per row (one exp/element, one log/row).
    m = jnp.max(x, axis=-1, keepdims=True)
    lse = jnp.log(jnp.sum(jnp.exp(x - m), axis=-1, keepdims=True)) + m   # (tile_b, 1)

    # logprobs = x - lse  =>
    #   nll    = sum((lse - x) * t) = lse * sum(t) - sum(x * t)
    #   smooth = mean(lse - x)      = lse - mean(x)
    sum_t = jnp.sum(t, axis=-1, keepdims=True)
    sum_xt = jnp.sum(x * t, axis=-1, keepdims=True)
    mean_x = jnp.sum(x, axis=-1, keepdims=True) * inv_c

    row_loss = confidence * (lse * sum_t - sum_xt) + smoothing * (lse - mean_x)

    # Mask rows that only exist because of padding to a multiple of tile_b.
    row_ids = lax.broadcasted_iota(jnp.int32, (tile_b, 1), 0) + i * tile_b
    row_loss = jnp.where(row_ids < total_rows, row_loss, 0.0)

    # Per-tile partial sum; final mean happens in JAX (keeps grid "parallel").
    out_ref[...] = jnp.sum(row_loss).reshape(1, 1, 1)


def label_smoothing_loss(x, target, *, smoothing=0.1, tile_b=None,
                         vmem_limit_bytes=48 * 1024 * 1024):
    """Training-mode LabelSmoothing forward. x, target: (B, C). Returns scalar f32."""
    assert x.shape == target.shape and x.ndim == 2
    B, C = x.shape
    confidence = 1.0 - smoothing

    if tile_b is None:
        # Double-buffered input blocks + in-kernel f32 temporaries per row.
        bytes_per_row = C * (2 * (x.dtype.itemsize + target.dtype.itemsize) + 6 * 4)
        budget = vmem_limit_bytes // 2          # headroom for the compiler
        tile_b = (budget // bytes_per_row) // 8 * 8
        tile_b = int(max(8, min(tile_b, 1024)))
    tile_b = max(8, (int(tile_b) // 8) * 8)
    tile_b = min(tile_b, -(-B // 8) * 8)        # never exceed padded batch

    num_tiles = -(-B // tile_b)
    b_pad = num_tiles * tile_b
    if b_pad != B:
        pad = ((0, b_pad - B), (0, 0))
        x = jnp.pad(x, pad)
        target = jnp.pad(target, pad)

    kernel = functools.partial(
        _label_smoothing_kernel,
        confidence=float(confidence),
        smoothing=float(smoothing),
        inv_c=float(1.0 / C),
        total_rows=B,
        tile_b=tile_b,
    )

    partials = pl.pallas_call(
        kernel,
        out_shape=jax.ShapeDtypeStruct((num_tiles, 1, 1), jnp.float32),
        grid_spec=pltpu.PrefetchScalarGridSpec(
            num_scalar_prefetch=0,
            grid=(num_tiles,),
            in_specs=[
                pl.BlockSpec((tile_b, C), lambda i: (i, 0)),
                pl.BlockSpec((tile_b, C), lambda i: (i, 0)),
            ],
            out_specs=pl.BlockSpec((1, 1, 1), lambda i: (i, 0, 0)),
        ),
        compiler_params=pltpu.CompilerParams(
            dimension_semantics=("parallel",),
            vmem_limit_bytes=vmem_limit_bytes,
        ),
    )(x, target)

    return jnp.sum(partials) / jnp.float32(B)


def _reference(x, target, smoothing=0.1):
    confidence = 1.0 - smoothing
    xf = x.astype(jnp.float32)
    tf = target.astype(jnp.float32)
    logprobs = jax.nn.log_softmax(xf, axis=-1)
    nll = jnp.sum(-logprobs * tf, axis=-1)
    smooth = -jnp.mean(logprobs, axis=-1)
    return jnp.mean(confidence * nll + smoothing * smooth)


if __name__ == "__main__":
    key = jax.random.PRNGKey(0)
    k1, k2, k3, k4, k5 = jax.random.split(key, 5)

    # Test 1: even batch, one-hot targets, forced small tile (multi-tile path).
    B, C = 16, 32
    x1 = jax.random.normal(k1, (B, C), dtype=jnp.float32)
    labels = jax.random.randint(k2, (B,), 0, C)
    t1 = jax.nn.one_hot(labels, C, dtype=jnp.float32)
    loss1 = jax.block_until_ready(label_smoothing_loss(x1, t1, smoothing=0.1, tile_b=8))
    ref1 = _reference(x1, t1, smoothing=0.1)
    assert jnp.allclose(loss1, ref1, atol=1e-5, rtol=1e-5), (loss1, ref1)

    # Test 2: ragged batch (masked tail), soft targets, auto tile size.
    B2 = 13
    x2 = jax.random.normal(k3, (B2, C), dtype=jnp.float32)
    t2 = jax.nn.softmax(jax.random.normal(k4, (B2, C), dtype=jnp.float32), axis=-1)
    loss2 = jax.block_until_ready(label_smoothing_loss(x2, t2, smoothing=0.1))
    ref2 = _reference(x2, t2, smoothing=0.1)
    assert jnp.allclose(loss2, ref2, atol=1e-5, rtol=1e-5), (loss2, ref2)

    # Test 3: bf16 logits (upcast in-kernel, halves HBM read traffic).
    x3 = jax.random.normal(k5, (B, C), dtype=jnp.bfloat16)
    loss3 = jax.block_until_ready(label_smoothing_loss(x3, t1, smoothing=0.1))
    ref3 = _reference(x3, t1, smoothing=0.1)
    assert jnp.allclose(loss3, ref3, atol=1e-5, rtol=1e-5), (loss3, ref3)

    print("KERNEL_OK")
</pallas_src>

<mosaic_0001>
module attributes {stable_mosaic.version = 11 : i64} {
  func.func @_label_smoothing_kernel(%arg0: i32, %arg1: memref<8x32xf32, #tpu.memory_space<vmem>>, %arg2: memref<8x32xf32, #tpu.memory_space<vmem>>, %arg3: memref<1x1x1xf32, #tpu.memory_space<vmem>>) attributes {dimension_semantics = [#tpu.dimension_semantics<parallel>], iteration_bounds = array<i64: 2>, scalar_prefetch = 0 : i64, scratch_operands = 0 : i64, tpu.core_type = #tpu.core_type<tc>, window_params = [{transform_indices = @transform_0, window_bounds = array<i64: 8, 32>}, {transform_indices = @transform_1, window_bounds = array<i64: 8, 32>}, {transform_indices = @transform_2, window_bounds = array<i64: 1, 1, 1>}]} {
    %c0 = arith.constant 0 : index
    %c0_0 = arith.constant 0 : index
    %0 = vector.load %arg1[%c0, %c0_0] : memref<8x32xf32, #tpu.memory_space<vmem>>, vector<8x32xf32>
    %c0_1 = arith.constant 0 : index
    %c0_2 = arith.constant 0 : index
    %1 = vector.load %arg2[%c0_1, %c0_2] : memref<8x32xf32, #tpu.memory_space<vmem>>, vector<8x32xf32>
    %cst = arith.constant dense<0xFF800000> : vector<8xf32>
    %2 = vector.multi_reduction <maximumf>, %0, %cst [1] : vector<8x32xf32> to vector<8xf32>
    %3 = vector.shape_cast %2 : vector<8xf32> to vector<8x1xf32>
    %4 = vector.broadcast %3 : vector<8x1xf32> to vector<8x32xf32>
    %5 = arith.subf %0, %4 : vector<8x32xf32>
    %6 = math.exp %5 : vector<8x32xf32>
    %cst_3 = arith.constant dense<0.000000e+00> : vector<8xf32>
    %7 = vector.multi_reduction <add>, %6, %cst_3 [1] : vector<8x32xf32> to vector<8xf32>
    %8 = vector.shape_cast %7 : vector<8xf32> to vector<8x1xf32>
    %9 = math.log %8 : vector<8x1xf32>
    %10 = arith.addf %9, %3 : vector<8x1xf32>
    %cst_4 = arith.constant dense<0.000000e+00> : vector<8xf32>
    %11 = vector.multi_reduction <add>, %1, %cst_4 [1] : vector<8x32xf32> to vector<8xf32>
    %12 = vector.shape_cast %11 : vector<8xf32> to vector<8x1xf32>
    %13 = arith.mulf %0, %1 : vector<8x32xf32>
    %cst_5 = arith.constant dense<0.000000e+00> : vector<8xf32>
    %14 = vector.multi_reduction <add>, %13, %cst_5 [1] : vector<8x32xf32> to vector<8xf32>
    %15 = vector.shape_cast %14 : vector<8xf32> to vector<8x1xf32>
    %cst_6 = arith.constant dense<0.000000e+00> : vector<8xf32>
    %16 = vector.multi_reduction <add>, %0, %cst_6 [1] : vector<8x32xf32> to vector<8xf32>
    %17 = vector.shape_cast %16 : vector<8xf32> to vector<8x1xf32>
    %cst_7 = arith.constant 3.125000e-02 : f32
    %18 = vector.broadcast %cst_7 : f32 to vector<8x1xf32>
    %19 = arith.mulf %17, %18 : vector<8x1xf32>
    %20 = arith.mulf %10, %12 : vector<8x1xf32>
    %21 = arith.subf %20, %15 : vector<8x1xf32>
    %cst_8 = arith.constant 0.899999976 : f32
    %22 = vector.broadcast %cst_8 : f32 to vector<8x1xf32>
    %23 = arith.mulf %22, %21 : vector<8x1xf32>
    %24 = arith.subf %10, %19 : vector<8x1xf32>
    %cst_9 = arith.constant 1.000000e-01 : f32
    %25 = vector.broadcast %cst_9 : f32 to vector<8x1xf32>
    %26 = arith.mulf %25, %24 : vector<8x1xf32>
    %27 = arith.addf %23, %26 : vector<8x1xf32>
    %28 = tpu.iota {dimensions = array<i32: 0>} : vector<8x1xi32>
    %c8_i32 = arith.constant 8 : i32
    %29 = arith.muli %arg0, %c8_i32 : i32
    %30 = vector.broadcast %29 : i32 to vector<8x1xi32>
    %31 = arith.addi %28, %30 : vector<8x1xi32>
    %c16_i32 = arith.constant 16 : i32
    %32 = vector.broadcast %c16_i32 : i32 to vector<8x1xi32>
    %33 = arith.cmpi slt, %31, %32 : vector<8x1xi32>
    %cst_10 = arith.constant 0.000000e+00 : f32
    %34 = vector.broadcast %cst_10 : f32 to vector<8x1xf32>
    %35 = arith.select %33, %27, %34 : vector<8x1xi1>, vector<8x1xf32>
    %36 = vector.shape_cast %35 : vector<8x1xf32> to vector<1x8x1xf32>
    %cst_11 = arith.constant dense<0.000000e+00> : vector<1xf32>
    %37 = vector.multi_reduction <add>, %36, %cst_11 [1, 2] : vector<1x8x1xf32> to vector<1xf32>
    %38 = vector.shape_cast %37 : vector<1xf32> to vector<1x1x1xf32>
    %39 = vector.extract %38[0, 0, 0] : f32 from vector<1x1x1xf32>
    %40 = vector.broadcast %39 : f32 to vector<1x1x1xf32>
    %c0_12 = arith.constant 0 : index
    %c0_13 = arith.constant 0 : index
    %c0_14 = arith.constant 0 : index
    %41 = vector.load %arg3[%c0_12, %c0_13, %c0_14] : memref<1x1x1xf32, #tpu.memory_space<vmem>>, vector<1x1x1xf32>
    tpu.vector_store %arg3[%c0_12, %c0_13, %c0_14], %40 {strides = array<i32>} : memref<1x1x1xf32, #tpu.memory_space<vmem>>, vector<1x1x1xf32>,
    return
  }
  func.func @transform_0(%arg0: i32) -> (i32, i32) {
    %c0_i32 = arith.constant 0 : i32
    %c0_i32_0 = arith.constant 0 : i32
    return %arg0, %c0_i32 : i32, i32
  }
  func.func @transform_1(%arg0: i32) -> (i32, i32) {
    %c0_i32 = arith.constant 0 : i32
    %c0_i32_0 = arith.constant 0 : i32
    return %arg0, %c0_i32 : i32, i32
  }
  func.func @transform_2(%arg0: i32) -> (i32, i32, i32) {
    %c0_i32 = arith.constant 0 : i32
    %c0_i32_0 = arith.constant 0 : i32
    %c0_i32_1 = arith.constant 0 : i32
    return %arg0, %c0_i32, %c0_i32_0 : i32, i32, i32
  }
}

</mosaic_0001>

<bundles_post_ra>
// kernel: tpu_custom_call.1
= control target key start
LH: loop header
LB: loop body
LE: loop exit
PB: predicated region body
PF: predicated region fallthrough
CT: control target
= control target key end

     0   :  { %7 = vsyncpa [#allocation3], 0  ;;  %s669_s0 = inlined_call_operand.hbm [shape: f32[16,32], index: 0, kind: input, shape index: {}]   ;;  %s670_s1 = inlined_call_operand.hbm [shape: f32[16,32], index: 1, kind: input, shape index: {}]   ;;  %s671_s2 = inlined_call_operand.vmem [shape: f32[2,1,1], index: 2, kind: output, shape index: {}]  }
   0x1   :  { %9 = vsyncpa [#allocation3 + $0x1], 0 }
   0x2   :  { %10 = vsyncpa [#allocation5], 0 }
   0x3   :  { %12 = vsyncpa [#allocation5 + $0x1], 0  ;;  %s509_s9 = smov 0   ;;  %s511_s10 = smov 0  }
   0x4   :  { %s513_s11 = smov 0   ;;  %s515_s12 = smov 0  }
   0x5 LB: > { %s528_s13 = sadd.s32 4294967295, %s490_s12   ;;  %s531_s14 = sadd.s32 1, %s490_s12   ;;  %s490_s12 = sphi %s515_s12, %s683_s12   ;;  %s486_s11 = sphi %s513_s11, %s682_s11   ;;  %s482_s10 = sphi %s511_s10, %s681_s10   ;;  %s478_s9 = sphi %s509_s9, %s680_s9  }
   0x6   : > { %s22_s15 = ssub.s32 %s490_s12, %s531_s14  ;;  %s25_s16 = sadd.s32 1, %s486_s11 }
   0x7   : > { %p23_p0 = scmp.eq.s32.totalorder %s22_s15, 0  ;;  %p32_p1 = scmp.ne.s32.totalorder %s486_s11, %s482_s10 }
   0x8   : > { %p33_p2 = scmp.eq.s32.totalorder %s490_s12, 0  ;;  %p38_p3 = scmp.ne.s32.totalorder %s482_s10, %s478_s9 }
   0x9   : > { %s541_s17 = scalar_select %p23_p0, %s486_s11, %s25_s16  }
   0xa   : > { %p34_p4 = por %p33_p2, %p32_p1  ;;  %p39_p5 = scmp.eq.s32.totalorder %s528_s13, 0 }
   0xb   : > { %p355_p6 = scmp.lt.s32.totalorder %s490_s12, 2  ;;  %s550_s19 = sand.u32 1, %s486_s11  }
   0xc   : > { %p545_p7 = por %p39_p5, %p38_p3  ;;  %s332_s20 = sshll.u32 %s550_s19, 3 }
   0xd   : > { %s333_s21 = sshll.u32 %s490_s12, 7  ;;  %s118_s25 = scalar_lea.vmem [#allocation2], %s332_s20 }
   0xe   : > { %s673_s18 = scalar_select %p545_p7, 1, 0 }
   0xf   : > { %s559_s24 = scalar_lea.hbm %s669_s0, %s333_s21  ;;  %s125_s26 = sshll.u32 %s118_s25, 4  ;;  %s563_s26 = int_to_ptr.vmem [resolvable:$true] %s125_s26 }
  0x10   : > { %p565_p8 = pnand %p355_p6, %p34_p4  ;;  %s115_s28 = scalar_lea.sflag [#allocation3], %s550_s19 }
  0x11   : > { %s392_s29 = scalar_lea.hbm %s559_s24, 128  ;;  %s397_s4 = scalar_lea.hbm %s669_s0, 256 }
  0x12   : > { %p393_p11 = scmp.ne.s32.totalorder %s559_s24, %s392_s29  ;;  %p394_p12 = pneg %p565_p8 }
  0x13   : > { %p398_p1 = scmp.lt.u32.totalorder %s559_s24, %s669_s0  ;;  %p399_p2 = scmp.lt.u32.totalorder %s397_s4, %s392_s29 }
  0x14   : > { %p395_p13 = pnand %p394_p12, %p393_p11  ;;  %p401_p4 = scmp.lt.u32.totalorder %s392_s29, %s559_s24 }
  0x15   : > { %p400_p3 = por %p399_p2, %p398_p1 }
  0x16   : > { %p396_p0 = pneg %p395_p13 }
  0x17   : > { %p402_p5 = por %p401_p4, %p400_p3 }
  0x19   : > { %p403_p6 = pnand %p402_p5, %p396_p0 }
  0x1b   : > { %406 = shalt.err (!%p403_p6)
}
  0x1c   : > { %s407_s7 = scalar_lea.vmem %s563_s26, 128  ;;  %s492_s8 = smov [#allocation2]  }
  0x1d   : > { %p408_p11 = scmp.ne.s32.totalorder %s563_s26, %s407_s7  ;;  %s412_s9 = sshll.u32 %s492_s8, 4  ;;  %s413_s9 = int_to_ptr.vmem [resolvable:$false] %s412_s9 }
  0x1e   : > { %s414_s15 = scalar_lea.vmem %s413_s9, 256  ;;  %p415_p10 = scmp.lt.s32.totalorder %s563_s26, %s413_s9 }
  0x1f   : > { %p410_p13 = pnand %p408_p11, %p394_p12  ;;  %p416_p1 = scmp.lt.s32.totalorder %s414_s15, %s407_s7 }
  0x21   : > { %p411_p9 = pneg %p410_p13  ;;  %p417_p2 = por %p416_p1, %p415_p10 }
  0x23   : > { %p418_p3 = pnand %p417_p2, %p411_p9 }
  0x25   : > { %421 = shalt.err (!%p418_p3)
}
  0x26   : > { %351 = dma.hbm_to_vmem [thread:$0]  (!%p565_p8), %s559_s24, 128, %s563_s26, %s115_s28  }
  0x27   : > { %p675_p0 = scmp.lt.s32.totalorder %s490_s12, 3  ;;  %p676_p4 = scmp.ge.s32.totalorder %s490_s12, 1 }
  0x28   : > { %s610_s25 = scalar_lea.hbm %s670_s1, %s333_s21  ;;  %s136_s29 = scalar_lea.vmem [#allocation4], %s332_s20 }
  0x29   : > { %p601_p5 = pnand %p676_p4, %p675_p0  ;;  %s143_s30 = sshll.u32 %s136_s29, 4  ;;  %s144_s30 = int_to_ptr.vmem [resolvable:$true] %s143_s30 }
  0x2a   : > { %s133_s24 = scalar_lea.sflag [#allocation5], %s550_s19  ;;  %s422_s26 = scalar_lea.hbm %s610_s25, 128 }
  0x2b   : > { %s677_s16 = scalar_select %p601_p5, 1, 0 }
  0x2c   : > { %p423_p9 = scmp.ne.s32.totalorder %s610_s25, %s422_s26  ;;  %s427_s21 = scalar_lea.hbm %s670_s1, 256 }
  0x2d   : > { %p428_p11 = scmp.lt.u32.totalorder %s610_s25, %s670_s1  ;;  %p429_p13 = scmp.lt.u32.totalorder %s427_s21, %s422_s26 }
  0x2e   : > { %p425_p10 = pnand %p423_p9, %p394_p12  ;;  %p431_p2 = scmp.lt.u32.totalorder %s422_s26, %s610_s25 }
  0x2f   : > { %p430_p1 = por %p429_p13, %p428_p11 }
  0x30   : > { %p426_p6 = pneg %p425_p10 }
  0x31   : > { %p432_p3 = por %p431_p2, %p430_p1 }
  0x33   : > { %p433_p0 = pnand %p432_p3, %p426_p6 }
  0x35   : > { %436 = shalt.err (!%p433_p0)
}
  0x36   : > { %s437_s19 = scalar_lea.vmem %s144_s30, 128  ;;  %s493_s20 = smov [#allocation4]  }
  0x37   : > { %p438_p4 = scmp.ne.s32.totalorder %s144_s30, %s437_s19  ;;  %s442_s5 = sshll.u32 %s493_s20, 4  ;;  %s443_s5 = int_to_ptr.vmem [resolvable:$false] %s442_s5 }
  0x38   : > { %s444_s6 = scalar_lea.vmem %s443_s5, 256  ;;  %p445_p7 = scmp.lt.s32.totalorder %s144_s30, %s443_s5 }
  0x39   : > { %p440_p9 = pnand %p438_p4, %p394_p12  ;;  %p446_p5 = scmp.lt.s32.totalorder %s444_s6, %s437_s19 }
  0x3b   : > { %p441_p10 = pneg %p440_p9  ;;  %p447_p11 = por %p446_p5, %p445_p7 }
  0x3d   : > { %p448_p13 = pnand %p447_p11, %p441_p10 }
  0x3f   : > { %451 = shalt.err (!%p448_p13)
}
  0x40   : > { %354 = dma.hbm_to_vmem [thread:$0]  (!%p565_p8), %s610_s25, 128, %s144_s30, %s133_s24  }
  0x41   : > { %p678_p6 = scmp.ne.s32.totalorder %s677_s16, 0 }
  0x42   : > { %s154_s7 = sand.u32 (!%p678_p6), 1, %s482_s10   ;;  %p679_p12 = scmp.ne.s32.totalorder (!%p678_p6), %s673_s18, 0 }
  0x43   : > { %152 = sbr.rel (%p678_p6) target bundleno = 610 (0x262), region = 28  ;;  %s337_s8 = sshll.u32 (!%p678_p6), %s154_s7, 3 }
  0x44   : > { %s155_s9 = scalar_lea.sflag (!%p678_p6), [#allocation3], %s154_s7  ;;  %s158_s15 = scalar_lea.vmem (!%p678_p6), [#allocation2], %s337_s8 }
  0x4a   : > { %469 = dma.done.wait (%p679_p12), %s155_s9, 128  }
  0x4b   : > { %471 = vsyncadd (%p679_p12), %s155_s9, 4294967168  ;;  %s164_s22 = scalar_lea.sflag [#allocation5], %s154_s7  ;;  %s167_s23 = scalar_lea.vmem [#allocation4], %s337_s8 }
  0x4c   : > { %473 = dma.done.wait (%p679_p12), %s164_s22, 128  }
  0x4d   : > { %475 = vsyncadd (%p679_p12), %s164_s22, 4294967168  ;;  %vm196_vm0 = vcmask 261120   ;;  %v194_v0 = vld [vmem:[%s158_s15] sm:$0xff]  ;;  %v195_v2 = vld [vmem:[%s167_s23] sm:$0xff]  ;;  %v226_v15 = vlaneseq  ;;  %s339_s18 = sshll.u32 %s528_s13, 3  ;;  %vm233_vm2 = vcmask 7168  }
  0x4e   : > { %v197_v1 = vsel %vm196_vm0, %v194_v0, -inf  ;;  %v209_v3 = vsel %vm196_vm0, %v195_v2, 0.0  ;;  %v216_v4 = vsel %vm196_vm0, %v194_v0, 0.0  ;;  %v212_v8 = vmul.f32 %v195_v2, %v194_v0  ;;  %p191_p7 = scmp.lt.s32.totalorder %s528_s13, 1 }
  0x4f   : > { %198 = vmax.xlane.f32.xlu0 %v197_v1  ;;  %210 = vadd.xlane.f32.xlu1 %v209_v3  ;;  %v227_v19 = vshrl.u32 %v226_v15, 7  ;;  %v229_v21 = vstv %s339_s18  ;;  %vm245_vm3 = vcmask 0  }
  0x50   : > { %v213_v11 = vsel %vm196_vm0, %v212_v8, 0.0  ;;  %s685_s13 = smov (!%p191_p7, %s528_s13), 1 }
  0x51   : > { %v230_v25 = vadd.s32 %v229_v21, %v227_v19  ;;  %s193_s25 = scalar_lea.vmem %s671_s2, %s685_s13 }
  0x53   : > { %217 = vadd.xlane.f32.xlu1 %v216_v4  ;;  %vm231_vm1 = vcmp.lt.s32.totalorder %v230_v25, 16 }
  0xdc   : > { %v199_v5 = vpop.xlane.xlu0 %198  ;;  %v211_v13 = vpop.xlane.xlu1 %210 }
  0xdd   : > { %v200_v6 = vsub.f32 %v194_v0, %v199_v5 }
  0xdf   : > { %v201_v7 = vmul.f32 1.442695, %v200_v6 }
  0xe0   : > { %v218_v14 = vpop.xlane.xlu1 %217 }
  0xe1   : > { %388 = vpow2.f32 %v201_v7  ;;  %v219_v18 = vmul.f32 0.03125, %v218_v14 }
  0xeb   : > { %v389_v9 = vpop.eup %388 }
  0xec   : > { %v203_v10 = vsel %vm196_vm0, %v389_v9, 0.0 }
  0xed   : > { %204 = vadd.xlane.f32.xlu0 %v203_v10 }
  0xf1   : > { %214 = vadd.xlane.f32.xlu0 %v213_v11 }
 0x17a   : > { %v205_v12 = vpop.xlane.xlu0 %204 }
 0x17b   : > { %390 = vlog2.f32 %v205_v12 }
 0x17e   : > { %v215_v22 = vpop.xlane.xlu0 %214 }
 0x185   : > { %v391_v16 = vpop.eup %390 }
 0x186   : > { %v207_v17 = vmul.f32 0.6931472, %v391_v16 }
 0x188   : > { %v208_v20 = vadd.f32 %v207_v17, %v199_v5 }
 0x18a   : > { %v220_v23 = vmul.f32 %v211_v13, %v208_v20  ;;  %v223_v24 = vsub.f32 %v208_v20, %v219_v18 }
 0x18c   : > { %v221_v26 = vsub.f32 %v220_v23, %v215_v22  ;;  %v224_v27 = vmul.f32 0.1, %v223_v24 }
 0x18e   : > { %v222_v28 = vmul.f32 0.9, %v221_v26 }
 0x190   : > { %v225_v29 = vadd.f32 %v224_v27, %v222_v28 }
 0x192   : > { %v232_v30 = vsel %vm231_vm1, %v225_v29, 0.0 }
 0x193   : > { %v234_v31 = vsel %vm233_vm2, %v232_v30, 0.0 }
 0x194   : > { %235 = vadd.xlane.f32.xlu1 %v234_v31 }
 0x221   : > { %v236_v32 = vpop.xlane.xlu1 %235 }
 0x222   : > { %v237_v33 = vrot.slane %v236_v32, 4 }
 0x224   : > { %v238_v34 = vadd.f32 %v237_v33, %v236_v32 }
 0x226   : > { %v239_v35 = vrot.slane %v238_v34, 2 }
 0x228   : > { %v240_v36 = vadd.f32 %v239_v35, %v238_v34 }
 0x22a   : > { %v241_v37 = vrot.slane %v240_v36, 1 }
 0x22c   : > { %v242_v38 = vadd.f32 %v241_v37, %v240_v36 }
 0x22e   : > { %342 = vpush %v242_v38 }
 0x25f   : > { %s343_s29 = spop %342 }
 0x260   : > { %v244_v39 = vstv %s343_s29 }
 0x261   : > { %246 = vst.msk [vmem:[%s193_s25] sm:$0x1] %vm245_vm3, %v244_v39 }
 0x262 PF: > { %p15_p8 = scmp.ge.s32.totalorder %s531_s14, 4   ;;  %s680_s9 = smov %s482_s10 }
 0x263   : > { %s681_s10 = smov %s486_s11  ;;  %s682_s11 = smov %s541_s17 }
 0x264   : > { %s683_s12 = smov %s531_s14  ;;  %17 = sbr.rel (!%p15_p8) target bundleno = 5 (0x5), region = 81 }
 0x26b   :  { %264 = vsyncpa [#allocation3], 1 }
 0x26c   :  { %266 = vsyncpa [#allocation3 + $0x1], 1 }
 0x26d   :  { %267 = vsyncpa [#allocation5], 1 }
 0x26e   :  { %269 = vsyncpa [#allocation5 + $0x1], 1 }

</bundles_post_ra>
